<compile_context>
chip_gen: v7x
topology: tpu7x:2x2x1
jax: 0.10.0
libtpu: 0.0.40
codegen_flags: <defaults>
</compile_context>

<pallas_src>
import functools

import jax
import jax.numpy as jnp
from jax.experimental import pallas as pl
from jax.experimental.pallas import tpu as pltpu

# ----------------------------- model config ---------------------------------
ATOM_VOCAB = ['C', 'N', 'O', 'S', 'P', 'F', 'I', 'Cl', 'Br', 'H']  # 10 atoms
D_N = len(ATOM_VOCAB) + 18          # node feature dim = 28
IN_CHANNELS = 8                     # emb_linear output
EMB_SIZE_ARG = 16                   # args.emb_size
EMB_SIZE = EMB_SIZE_ARG * 2         # self.emb_size = args.emb_size * 2 = 32
LAYER_NUM_G = 3                     # args.layer_num_g -> 3 GCN layers total

LANE = 128                          # TPU lane width (last dim)
SUBLANE = 8                         # TPU sublane width (2nd-to-last dim)
F_PAD = LANE                        # all feature dims (28 / 8 / 32) pad to 128


# ------------------------------ small helpers --------------------------------
def _round_up(x, m):
    return ((x + m - 1) // m) * m


def _pad2(x, shape):
    """Zero-pad a 2-D array up to `shape` (zero padding is exact / inert for
    the sums, ReLU and residual in this forward)."""
    return jnp.pad(x, [(0, t - s) for s, t in zip(x.shape, shape)])


def _full_spec(shape):
    """Whole-array block (block_shape == array shape satisfies TPU tiling)."""
    nd = len(shape)
    return pl.BlockSpec(shape, lambda i, _nd=nd: (0,) * _nd)


# ------------------------------ fused kernel ---------------------------------
def _gcn_embed_fused_kernel(node_x_ref, adj_ref, pool_ref, w_stack_ref,
                            node_out_ref, graph_out_ref, *, num_gcn_layers):
    """[aggregate -> linear -> relu (-> +res)] x L -> sum-pool, fully fused.

    emb_linear is pre-folded into w_stack[0] on the host.  All MXU inputs are
    bf16; accumulation and the cross-layer activation are f32.  The activation
    stays a live traced value (register/VMEM-resident); node_out_ref is
    written exactly once.
    """
    bf16, f32 = jnp.bfloat16, jnp.float32

    adj = adj_ref[...]                       # (N_pad, N_pad) bf16, loaded once

    # Layer 0: emb_linear folded into W0'; no residual.
    agg = jnp.dot(adj, node_x_ref[...], preferred_element_type=f32)
    x = jnp.maximum(
        jnp.dot(agg.astype(bf16), w_stack_ref[0], preferred_element_type=f32),
        0.0)

    # Layers 1..L-1 (unrolled at trace time); residual = layer input.
    for i in range(1, num_gcn_layers):
        agg = jnp.dot(adj, x.astype(bf16), preferred_element_type=f32)
        h = jnp.maximum(
            jnp.dot(agg.astype(bf16), w_stack_ref[i],
                    preferred_element_type=f32),
            0.0)
        x = h + x

    node_out_ref[...] = x
    # SumPooling fused into the epilogue: emb_graph = P @ x.
    graph_out_ref[...] = jnp.dot(pool_ref[...], x.astype(bf16),
                                 preferred_element_type=f32)


# --------------------------- one-time preparation -----------------------------
def prepare_weights(params):
    """Fold emb_linear into layer 0 (in f32), zero-pad every weight to
    (F_PAD, F_PAD) and stack into a single (L, F_PAD, F_PAD) bf16 operand."""
    w0 = jnp.dot(params['w_emb'], params['gcn'][0],
                 preferred_element_type=jnp.float32)        # (d_n, emb) f32
    ws = [w0] + list(params['gcn'][1:])
    stacked = jnp.stack([_pad2(w.astype(jnp.float32), (F_PAD, F_PAD))
                         for w in ws])
    return stacked.astype(jnp.bfloat16)


def prepare_graph_inputs(node_x, adj, pool_mat):
    """Pad to lane-dense tiles once per graph (cast to bf16 BEFORE padding so
    the O(N^2) adjacency is never rewritten in f32)."""
    N = node_x.shape[0]
    B = pool_mat.shape[0]
    assert max(node_x.shape[1], IN_CHANNELS, EMB_SIZE) <= F_PAD
    n_pad = _round_up(max(N, SUBLANE), LANE)   # N is on the lane axis of A / P
    b_pad = _round_up(B, SUBLANE)
    bf16 = jnp.bfloat16
    node_x_p = _pad2(node_x.astype(bf16), (n_pad, F_PAD))
    adj_p = _pad2(adj.astype(bf16), (n_pad, n_pad))
    pool_p = _pad2(pool_mat.astype(bf16), (b_pad, n_pad))
    return node_x_p, adj_p, pool_p


# ------------------------------ forward pass ---------------------------------
def gcn_embed_forward(w_stack, node_x_p, adj_p, pool_p, *,
                      num_nodes, num_graphs,
                      att_mask=None, adj=None, pool_mat=None):
    num_layers = w_stack.shape[0]
    n_pad, f_pad = node_x_p.shape
    b_pad = pool_p.shape[0]

    emb_node_pad, emb_graph_pad = pl.pallas_call(
        functools.partial(_gcn_embed_fused_kernel, num_gcn_layers=num_layers),
        grid=(1,),
        in_specs=[_full_spec((n_pad, f_pad)),               # node features
                  _full_spec((n_pad, n_pad)),               # adjacency
                  _full_spec((b_pad, n_pad)),               # pooling membership
                  _full_spec((num_layers, f_pad, f_pad))],  # stacked weights
        out_specs=(_full_spec((n_pad, f_pad)),
                   _full_spec((b_pad, f_pad))),
        out_shape=(jax.ShapeDtypeStruct((n_pad, f_pad), jnp.float32),
                   jax.ShapeDtypeStruct((b_pad, f_pad), jnp.float32)),
        compiler_params=pltpu.CompilerParams(
            dimension_semantics=("arbitrary",),
            vmem_limit_bytes=32 * 1024 * 1024),
    )(node_x_p, adj_p, pool_p, w_stack)

    emb_node = emb_node_pad[:num_nodes, :EMB_SIZE]
    emb_graph = emb_graph_pad[:num_graphs, :EMB_SIZE]

    # "g" stand-in: batched-graph node data and structure.
    g = {'x': emb_node, 'att_mask': att_mask, 'adj': adj,
         'graph_membership': pool_mat}
    return g, emb_node, emb_graph


# ----------------------------- parameters ------------------------------------
def init_params(key):
    """Deterministic init matching the PyTorch module's shapes.

    nn.Linear weights are (out, in) in torch; we store them transposed
    (in, out) so the kernel computes x @ W directly.
    """
    ks = jax.random.split(key, 1 + LAYER_NUM_G)

    def lin(k, fan_in, fan_out):
        bound = 1.0 / jnp.sqrt(jnp.float32(fan_in))
        return jax.random.uniform(k, (fan_in, fan_out), jnp.float32,
                                  -bound, bound)

    params = {
        'w_emb': lin(ks[0], D_N, IN_CHANNELS),
        'gcn': [lin(ks[1], IN_CHANNELS, EMB_SIZE)] +
               [lin(ks[1 + i], EMB_SIZE, EMB_SIZE)
                for i in range(1, LAYER_NUM_G)],
    }
    return params


# ------------------------------ reference ------------------------------------
def reference_forward(params, node_x, adj, pool_mat):
    """Pure-JAX reference on the UNPADDED arrays with the same precision
    policy and the same emb_linear fold as the kernel (f32 fold, bf16 MXU
    inputs, f32 accumulation).  Zero padding inside the kernel is exact, so
    this also catches padding / pooling / residual bugs."""
    bf16, f32 = jnp.bfloat16, jnp.float32
    w0 = jnp.dot(params['w_emb'], params['gcn'][0],
                 preferred_element_type=f32).astype(bf16)
    ws = [w0] + [w.astype(bf16) for w in params['gcn'][1:]]
    adj_b = adj.astype(bf16)

    agg = jnp.dot(adj_b, node_x.astype(bf16), preferred_element_type=f32)
    x = jnp.maximum(jnp.dot(agg.astype(bf16), ws[0],
                            preferred_element_type=f32), 0.0)
    for w in ws[1:]:
        agg = jnp.dot(adj_b, x.astype(bf16), preferred_element_type=f32)
        h = jnp.maximum(jnp.dot(agg.astype(bf16), w,
                                preferred_element_type=f32), 0.0)
        x = h + x
    graph = jnp.dot(pool_mat.astype(bf16), x.astype(bf16),
                    preferred_element_type=f32)
    return x, graph


# ------------------------------ graph glue -----------------------------------
def build_batched_graph(node_counts, edge_lists, att_lists, key):
    """Build dense batched-graph tensors (plain JAX glue, not the hot path)."""
    N = sum(node_counts)
    adj = jnp.zeros((N, N), jnp.float32)
    offset = 0
    for n, edges in zip(node_counts, edge_lists):
        for (s, d) in edges:                         # bidirectional edges
            adj = adj.at[offset + d, offset + s].add(1.0)
            adj = adj.at[offset + s, offset + d].add(1.0)
        offset += n
    # bf16 adjacency is exact only for small integer multiplicities.
    assert float(jnp.max(adj)) <= 256.0
    # SumPooling membership matrix (B, N)
    B = len(node_counts)
    pool = jnp.zeros((B, N), jnp.float32)
    offset = 0
    for b, n in enumerate(node_counts):
        pool = pool.at[b, offset:offset + n].set(1.0)
        offset += n
    # att_mask: F.one_hot(att_idx, num_nodes).sum(0).bool(), concatenated
    masks = []
    for n, att in zip(node_counts, att_lists):
        onehot = jax.nn.one_hot(jnp.asarray(att, jnp.int32), n).sum(0)
        masks.append(onehot.astype(bool))
    att_mask = jnp.concatenate(masks, axis=0)
    # node features x : (N, d_n)
    node_x = jax.random.normal(key, (N, D_N), jnp.float32)
    return node_x, adj, pool, att_mask


# --------------------------------- main ---------------------------------------
if __name__ == "__main__":
    key = jax.random.PRNGKey(0)
    k_param, k_feat = jax.random.split(key)

    params = init_params(k_param)

    # Two small molecule-like graphs: 5 nodes (ring) and 3 nodes (path).
    node_counts = [5, 3]                             # N = 8 total nodes
    edge_lists = [
        [(0, 1), (1, 2), (2, 3), (3, 4), (4, 0)],    # graph 0
        [(0, 1), (1, 2)],                            # graph 1
    ]
    att_lists = [[0, 2], [1]]                        # ob_att per graph

    node_x, adj, pool_mat, att_mask = build_batched_graph(
        node_counts, edge_lists, att_lists, k_feat)
    N, B = node_x.shape[0], pool_mat.shape[0]

    # One-time prep (fold + pad + bf16 cast) -- hoisted out of the forward.
    w_stack = prepare_weights(params)
    node_x_p, adj_p, pool_p = prepare_graph_inputs(node_x, adj, pool_mat)

    g, emb_node, emb_graph = gcn_embed_forward(
        w_stack, node_x_p, adj_p, pool_p,
        num_nodes=N, num_graphs=B,
        att_mask=att_mask, adj=adj, pool_mat=pool_mat)
    jax.block_until_ready((emb_node, emb_graph))

    # Sanity check vs precision-matched pure-JAX reference.
    ref_node, ref_graph = reference_forward(params, node_x, adj, pool_mat)
    assert emb_node.shape == (N, EMB_SIZE)
    assert emb_graph.shape == (B, EMB_SIZE)
    assert jnp.allclose(emb_node, ref_node, atol=1e-4, rtol=1e-4)
    assert jnp.allclose(emb_graph, ref_graph, atol=1e-4, rtol=1e-4)

    print("KERNEL_OK")
</pallas_src>

<mosaic_0001>
module attributes {stable_mosaic.version = 11 : i64} {
  func.func @_gcn_embed_fused_kernel(%arg0: i32, %arg1: memref<128x128xbf16, #tpu.memory_space<vmem>>, %arg2: memref<128x128xbf16, #tpu.memory_space<vmem>>, %arg3: memref<8x128xbf16, #tpu.memory_space<vmem>>, %arg4: memref<3x128x128xbf16, #tpu.memory_space<vmem>>, %arg5: memref<128x128xf32, #tpu.memory_space<vmem>>, %arg6: memref<8x128xf32, #tpu.memory_space<vmem>>) attributes {dimension_semantics = [#tpu.dimension_semantics<arbitrary>], iteration_bounds = array<i64: 1>, scalar_prefetch = 0 : i64, scratch_operands = 0 : i64, tpu.core_type = #tpu.core_type<tc>, window_params = [{pipeline_mode = #tpu.pipeline_mode<synchronous>, transform_indices = @transform_0, window_bounds = array<i64: 128, 128>}, {pipeline_mode = #tpu.pipeline_mode<synchronous>, transform_indices = @transform_1, window_bounds = array<i64: 128, 128>}, {pipeline_mode = #tpu.pipeline_mode<synchronous>, transform_indices = @transform_2, window_bounds = array<i64: 8, 128>}, {pipeline_mode = #tpu.pipeline_mode<synchronous>, transform_indices = @transform_3, window_bounds = array<i64: 3, 128, 128>}, {pipeline_mode = #tpu.pipeline_mode<synchronous>, transform_indices = @transform_4, window_bounds = array<i64: 128, 128>}, {pipeline_mode = #tpu.pipeline_mode<synchronous>, transform_indices = @transform_5, window_bounds = array<i64: 8, 128>}]} {
    %c0 = arith.constant 0 : index
    %c0_0 = arith.constant 0 : index
    %0 = vector.load %arg2[%c0, %c0_0] : memref<128x128xbf16, #tpu.memory_space<vmem>>, vector<128x128xbf16>
    %c0_1 = arith.constant 0 : index
    %c0_2 = arith.constant 0 : index
    %1 = vector.load %arg1[%c0_1, %c0_2] : memref<128x128xbf16, #tpu.memory_space<vmem>>, vector<128x128xbf16>
    %cst = arith.constant dense<0.000000e+00> : vector<128x128xf32>
    %2 = tpu.matmul %0, %1, %cst {dimension_numbers = #tpu.dot_dimension_numbers<[1], [0], [0], [1], [0, 0, 1, 1], [], []>} : vector<128x128xbf16>, vector<128x128xbf16>, vector<128x128xf32> -> vector<128x128xf32>
    %3 = arith.truncf %2 : vector<128x128xf32> to vector<128x128xbf16>
    %c0_3 = arith.constant 0 : index
    %c0_4 = arith.constant 0 : index
    %c0_5 = arith.constant 0 : index
    %4 = vector.load %arg4[%c0_3, %c0_4, %c0_5] : memref<3x128x128xbf16, #tpu.memory_space<vmem>>, vector<1x128x128xbf16>
    %5 = vector.shape_cast %4 : vector<1x128x128xbf16> to vector<128x128xbf16>
    %cst_6 = arith.constant dense<0.000000e+00> : vector<128x128xf32>
    %6 = tpu.matmul %3, %5, %cst_6 {dimension_numbers = #tpu.dot_dimension_numbers<[1], [0], [0], [1], [0, 0, 1, 1], [], []>} : vector<128x128xbf16>, vector<128x128xbf16>, vector<128x128xf32> -> vector<128x128xf32>
    %cst_7 = arith.constant 0.000000e+00 : f32
    %7 = vector.broadcast %cst_7 : f32 to vector<128x128xf32>
    %8 = arith.maximumf %6, %7 : vector<128x128xf32>
    %9 = arith.truncf %8 : vector<128x128xf32> to vector<128x128xbf16>
    %cst_8 = arith.constant dense<0.000000e+00> : vector<128x128xf32>
    %10 = tpu.matmul %0, %9, %cst_8 {dimension_numbers = #tpu.dot_dimension_numbers<[1], [0], [0], [1], [0, 0, 1, 1], [], []>} : vector<128x128xbf16>, vector<128x128xbf16>, vector<128x128xf32> -> vector<128x128xf32>
    %11 = arith.truncf %10 : vector<128x128xf32> to vector<128x128xbf16>
    %c1 = arith.constant 1 : index
    %c0_9 = arith.constant 0 : index
    %c0_10 = arith.constant 0 : index
    %12 = vector.load %arg4[%c1, %c0_9, %c0_10] : memref<3x128x128xbf16, #tpu.memory_space<vmem>>, vector<1x128x128xbf16>
    %13 = vector.shape_cast %12 : vector<1x128x128xbf16> to vector<128x128xbf16>
    %cst_11 = arith.constant dense<0.000000e+00> : vector<128x128xf32>
    %14 = tpu.matmul %11, %13, %cst_11 {dimension_numbers = #tpu.dot_dimension_numbers<[1], [0], [0], [1], [0, 0, 1, 1], [], []>} : vector<128x128xbf16>, vector<128x128xbf16>, vector<128x128xf32> -> vector<128x128xf32>
    %cst_12 = arith.constant 0.000000e+00 : f32
    %15 = vector.broadcast %cst_12 : f32 to vector<128x128xf32>
    %16 = arith.maximumf %14, %15 : vector<128x128xf32>
    %17 = arith.addf %16, %8 : vector<128x128xf32>
    %18 = arith.truncf %17 : vector<128x128xf32> to vector<128x128xbf16>
    %cst_13 = arith.constant dense<0.000000e+00> : vector<128x128xf32>
    %19 = tpu.matmul %0, %18, %cst_13 {dimension_numbers = #tpu.dot_dimension_numbers<[1], [0], [0], [1], [0, 0, 1, 1], [], []>} : vector<128x128xbf16>, vector<128x128xbf16>, vector<128x128xf32> -> vector<128x128xf32>
    %20 = arith.truncf %19 : vector<128x128xf32> to vector<128x128xbf16>
    %c2 = arith.constant 2 : index
    %c0_14 = arith.constant 0 : index
    %c0_15 = arith.constant 0 : index
    %21 = vector.load %arg4[%c2, %c0_14, %c0_15] : memref<3x128x128xbf16, #tpu.memory_space<vmem>>, vector<1x128x128xbf16>
    %22 = vector.shape_cast %21 : vector<1x128x128xbf16> to vector<128x128xbf16>
    %cst_16 = arith.constant dense<0.000000e+00> : vector<128x128xf32>
    %23 = tpu.matmul %20, %22, %cst_16 {dimension_numbers = #tpu.dot_dimension_numbers<[1], [0], [0], [1], [0, 0, 1, 1], [], []>} : vector<128x128xbf16>, vector<128x128xbf16>, vector<128x128xf32> -> vector<128x128xf32>
    %cst_17 = arith.constant 0.000000e+00 : f32
    %24 = vector.broadcast %cst_17 : f32 to vector<128x128xf32>
    %25 = arith.maximumf %23, %24 : vector<128x128xf32>
    %26 = arith.addf %25, %17 : vector<128x128xf32>
    %c0_18 = arith.constant 0 : index
    %c0_19 = arith.constant 0 : index
    %27 = vector.load %arg5[%c0_18, %c0_19] : memref<128x128xf32, #tpu.memory_space<vmem>>, vector<128x128xf32>
    tpu.vector_store %arg5[%c0_18, %c0_19], %26 {strides = array<i32>} : memref<128x128xf32, #tpu.memory_space<vmem>>, vector<128x128xf32>,
    %c0_20 = arith.constant 0 : index
    %c0_21 = arith.constant 0 : index
    %28 = vector.load %arg3[%c0_20, %c0_21] : memref<8x128xbf16, #tpu.memory_space<vmem>>, vector<8x128xbf16>
    %29 = arith.truncf %26 : vector<128x128xf32> to vector<128x128xbf16>
    %cst_22 = arith.constant dense<0.000000e+00> : vector<8x128xf32>
    %30 = tpu.matmul %28, %29, %cst_22 {dimension_numbers = #tpu.dot_dimension_numbers<[1], [0], [0], [1], [0, 0, 1, 1], [], []>} : vector<8x128xbf16>, vector<128x128xbf16>, vector<8x128xf32> -> vector<8x128xf32>
    %c0_23 = arith.constant 0 : index
    %c0_24 = arith.constant 0 : index
    %31 = vector.load %arg6[%c0_23, %c0_24] : memref<8x128xf32, #tpu.memory_space<vmem>>, vector<8x128xf32>
    tpu.vector_store %arg6[%c0_23, %c0_24], %30 {strides = array<i32>} : memref<8x128xf32, #tpu.memory_space<vmem>>, vector<8x128xf32>,
    return
  }
  func.func @transform_0(%arg0: i32) -> (i32, i32) {
    %c0_i32 = arith.constant 0 : i32
    %c0_i32_0 = arith.constant 0 : i32
    %c0_i32_1 = arith.constant 0 : i32
    return %c0_i32, %c0_i32_0 : i32, i32
  }
  func.func @transform_1(%arg0: i32) -> (i32, i32) {
    %c0_i32 = arith.constant 0 : i32
    %c0_i32_0 = arith.constant 0 : i32
    %c0_i32_1 = arith.constant 0 : i32
    return %c0_i32, %c0_i32_0 : i32, i32
  }
  func.func @transform_2(%arg0: i32) -> (i32, i32) {
    %c0_i32 = arith.constant 0 : i32
    %c0_i32_0 = arith.constant 0 : i32
    %c0_i32_1 = arith.constant 0 : i32
    return %c0_i32, %c0_i32_0 : i32, i32
  }
  func.func @transform_3(%arg0: i32) -> (i32, i32, i32) {
    %c0_i32 = arith.constant 0 : i32
    %c0_i32_0 = arith.constant 0 : i32
    %c0_i32_1 = arith.constant 0 : i32
    %c0_i32_2 = arith.constant 0 : i32
    return %c0_i32, %c0_i32_0, %c0_i32_1 : i32, i32, i32
  }
  func.func @transform_4(%arg0: i32) -> (i32, i32) {
    %c0_i32 = arith.constant 0 : i32
    %c0_i32_0 = arith.constant 0 : i32
    %c0_i32_1 = arith.constant 0 : i32
    return %c0_i32, %c0_i32_0 : i32, i32
  }
  func.func @transform_5(%arg0: i32) -> (i32, i32) {
    %c0_i32 = arith.constant 0 : i32
    %c0_i32_0 = arith.constant 0 : i32
    %c0_i32_1 = arith.constant 0 : i32
    return %c0_i32, %c0_i32_0 : i32, i32
  }
}

</mosaic_0001>

<bundles_post_ra>
// kernel: tpu_custom_call.1
= control target key start
LH: loop header
LB: loop body
LE: loop exit
PB: predicated region body
PF: predicated region fallthrough
CT: control target
= control target key end

     0   :  { %11 = vsyncpa [#allocation3], 0  ;;  %s2056_s0 = inlined_call_operand.hbm [shape: bf16[128,128], index: 0, kind: input, shape index: {}]   ;;  %s2057_s1 = inlined_call_operand.hbm [shape: bf16[128,128], index: 1, kind: input, shape index: {}]   ;;  %s2058_s2 = inlined_call_operand.vmem [shape: bf16[8,128], index: 2, kind: input, shape index: {}]   ;;  %s2059_s3 = inlined_call_operand.hbm [shape: bf16[3,128,128], index: 3, kind: input, shape index: {}]   ;;  %s2060_s4 = inlined_call_operand.hbm [shape: f32[128,128], index: 4, kind: output, shape index: {0}]   ;;  %s2061_s5 = inlined_call_operand.hbm [shape: f32[8,128], index: 5, kind: output, shape index: {1}]  }
   0x1   :  { %12 = vsyncpa [#allocation6], 0 }
   0x2   :  { %13 = vsyncpa [#allocation4], 0 }
   0x3   :  { %14 = vsyncpa [#allocation10], 0  ;;  %s1711_s18 = smov [#allocation5]   ;;  %s1712_s20 = smov [#allocation2]  }
   0x4   :  { %s32_s19 = sshll.u32 %s1711_s18, 4  ;;  %s20_s21 = sshll.u32 %s1712_s20, 4  ;;  %s33_s19 = int_to_ptr.vmem [resolvable:$true] %s32_s19  ;;  %s1752_s21 = int_to_ptr.vmem [resolvable:$true] %s20_s21 }
   0x5   :  { %s1593_s24 = scalar_lea.hbm %s2057_s1, 1024 }
   0x6   :  { %p1594_p0 = scmp.ne.s32.totalorder %s2057_s1, %s1593_s24  ;;  %p1597_p1 = scmp.lt.u32.totalorder %s1593_s24, %s2057_s1 }
   0x8   :  { %p1599_p2 = pnand %p1597_p1, %p1594_p0 }
   0xa   :  { %1602 = shalt.err (!%p1599_p2)
}
   0xb   :  { %s1603_s29 = scalar_lea.vmem %s33_s19, 1024  ;;  %p1608_p4 = scmp.lt.s32.totalorder %s33_s19, %s33_s19 }
   0xc   :  { %p1604_p3 = scmp.ne.s32.totalorder %s33_s19, %s1603_s29  ;;  %p1609_p5 = scmp.lt.s32.totalorder %s1603_s29, %s1603_s29 }
   0xe   :  { %p1610_p6 = por %p1609_p5, %p1608_p4 }
  0x10   :  { %p1611_p7 = pnand %p1610_p6, %p1604_p3 }
  0x12   :  { %1614 = shalt.err (!%p1611_p7)
}
  0x13   :  { %s1713_s30 = smov 64   ;;  %s1714_s6 = smov 4  }
  0x14   :  { %38 = dma.hbm_to_vmem [thread:$0]  %s2057_s1, 1024, %s33_s19, [#allocation6], %s1713_s30, %s1713_s30, %s1714_s6  }
  0x15   :  { %s1615_s11 = scalar_lea.hbm %s2056_s0, 1024 }
  0x16   :  { %p1616_p8 = scmp.ne.s32.totalorder %s2056_s0, %s1615_s11  ;;  %p1619_p9 = scmp.lt.u32.totalorder %s1615_s11, %s2056_s0 }
  0x18   :  { %p1621_p10 = pnand %p1619_p9, %p1616_p8 }
  0x1a   :  { %1624 = shalt.err (!%p1621_p10)
}
  0x1b   :  { %s1625_s16 = scalar_lea.vmem %s1752_s21, 1024  ;;  %p1630_p12 = scmp.lt.s32.totalorder %s1752_s21, %s1752_s21 }
  0x1c   :  { %p1626_p11 = scmp.ne.s32.totalorder %s1752_s21, %s1625_s16  ;;  %p1631_p13 = scmp.lt.s32.totalorder %s1625_s16, %s1625_s16 }
  0x1e   :  { %p1632_p0 = por %p1631_p13, %p1630_p12 }
  0x20   :  { %p1633_p1 = pnand %p1632_p0, %p1626_p11 }
  0x22   :  { %1636 = shalt.err (!%p1633_p1)
}
  0x23   :  { %26 = dma.hbm_to_vmem [thread:$0]  %s2056_s0, 1024, %s1752_s21, [#allocation3], %s1713_s30, %s1713_s30, %s1714_s6  }
  0x24   :  { %s1715_s18 = smov [#allocation7]   ;;  %s1637_s23 = scalar_lea.hbm %s2059_s3, 3072 }
  0x25   :  { %s46_s19 = sshll.u32 %s1715_s18, 4  ;;  %p1638_p2 = scmp.ne.s32.totalorder %s2059_s3, %s1637_s23  ;;  %s47_s19 = int_to_ptr.vmem [resolvable:$true] %s46_s19 }
  0x26   :  { %p1641_p3 = scmp.lt.u32.totalorder %s1637_s23, %s2059_s3 }
  0x28   :  { %p1643_p4 = pnand %p1641_p3, %p1638_p2 }
  0x2a   :  { %1646 = shalt.err (!%p1643_p4)
}
  0x2b   :  { %s1647_s28 = scalar_lea.vmem %s47_s19, 3072  ;;  %p1652_p6 = scmp.lt.s32.totalorder %s47_s19, %s47_s19 }
  0x2c   :  { %p1648_p5 = scmp.ne.s32.totalorder %s47_s19, %s1647_s28  ;;  %p1653_p7 = scmp.lt.s32.totalorder %s1647_s28, %s1647_s28 }
  0x2e   :  { %p1654_p8 = por %p1653_p7, %p1652_p6 }
  0x30   :  { %p1655_p9 = pnand %p1654_p8, %p1648_p5 }
  0x32   :  { %1658 = shalt.err (!%p1655_p9)
}
  0x33   :  { %52 = dma.hbm_to_vmem [thread:$0]  %s2059_s3, 3072, %s47_s19, [#allocation6], %s1713_s30, %s1713_s30, %s1714_s6  }
  0x34   :  { %1703 = dma.done.wait [#allocation3], 1024  }
  0x35   :  { %1704 = vsyncadd [#allocation3], 4294966272 }
  0x36   :  { %1705 = dma.done.wait [#allocation6], 4096  }
  0x37   :  { %1706 = vsyncadd [#allocation6], 4294963200  ;;  %v1553_v0 = vld [vmem:[#allocation2] sm:$0xff]   ;;  %v1554_v1 = vld [vmem:[#allocation2 + $0x8] sm:$0xff]   ;;  %vm1717_vm0 = vmmov 0   ;;  %s1718_s30 = smov [#allocation8]  }
  0x38   :  { %1330 = vmatprep.subr.bf16.mxu0 %v1553_v0  ;;  %v1555_v2 = vld [vmem:[#allocation2 + $0x10] sm:$0xff]   ;;  %v1556_v3 = vld [vmem:[#allocation2 + $0x18] sm:$0xff]   ;;  %v1804_v4 = vld [vmem:[#allocation5] sm:$0xff]   ;;  %s1158_s6 = sshll.u32 %s1718_s30, 4  ;;  %s1159_s6 = int_to_ptr.vmem [resolvable:$true] %s1158_s6 }
  0x39   :  { %1331 = vmatpush3.bf16.msra.mxu0 %v1553_v0  ;;  %1346 = vmatprep.mubr.bf16.mxu0 %v1804_v4  ;;  %v1557_v5 = vld [vmem:[#allocation2 + $0x20] sm:$0xff]   ;;  %v1558_v6 = vld [vmem:[#allocation2 + $0x28] sm:$0xff]   ;;  %v1559_v9 = vld [vmem:[#allocation2 + $0x30] sm:$0xff]   ;;  %s1659_s7 = scalar_lea.vmem %s1159_s6, 2048  ;;  %p1664_p11 = scmp.lt.s32.totalorder %s1159_s6, %s1159_s6 }
  0x3a   :  { %1332 = vmatprep.subr.bf16.mxu0 %v1554_v1  ;;  %v1569_v7 = vld [vmem:[#allocation7] sm:$0xff]   ;;  %v1570_v8 = vld [vmem:[#allocation7 + $0x8] sm:$0xff]   ;;  %v1571_v10 = vld [vmem:[#allocation7 + $0x10] sm:$0xff]   ;;  %p1660_p10 = scmp.ne.s32.totalorder %s1159_s6, %s1659_s7  ;;  %p1665_p12 = scmp.lt.s32.totalorder %s1659_s7, %s1659_s7 }
  0x3b   :  { %1362 = vmatprep.subr.bf16.mxu1 %v1569_v7  ;;  %v1560_v11 = vld [vmem:[#allocation2 + $0x38] sm:$0xff]   ;;  %v1573_v13 = vld [vmem:[#allocation7 + $0x20] sm:$0xff]   ;;  %v1807_v14 = vld [vmem:[#allocation5 + $0x8] sm:$0xff]  }
  0x3c   :  { %1363 = vmatpush3.bf16.msra.mxu1 %v1569_v7  ;;  %v1572_v12 = vld [vmem:[#allocation7 + $0x18] sm:$0xff]   ;;  %v1809_v15 = vld [vmem:[#allocation5 + $0x10] sm:$0xff]   ;;  %v1574_v16 = vld [vmem:[#allocation7 + $0x28] sm:$0xff]   ;;  %p1666_p13 = por %p1665_p12, %p1664_p11 }
  0x3d   :  { %1333 = vmatpush3.bf16.msra.mxu0 %v1554_v1  ;;  %1364 = vmatprep.subr.bf16.mxu1 %v1570_v8  ;;  %v1575_v17 = vld [vmem:[#allocation7 + $0x30] sm:$0xff]   ;;  %v1813_v18 = vld [vmem:[#allocation5 + $0x18] sm:$0xff]   ;;  %v1815_v19 = vld [vmem:[#allocation5 + $0x20] sm:$0xff]  }
  0x3e   :  { %1334 = vmatprep.subr.bf16.mxu0 %v1555_v2  ;;  %v1819_v20 = vld [vmem:[#allocation5 + $0x28] sm:$0xff]   ;;  %v1821_v21 = vld [vmem:[#allocation5 + $0x30] sm:$0xff]   ;;  %v1825_v22 = vld [vmem:[#allocation5 + $0x38] sm:$0xff]   ;;  %p1667_p0 = pnand %p1666_p13, %p1660_p10 }
  0x3f   :  { %v1576_v23 = vld [vmem:[#allocation7 + $0x38] sm:$0xff]   ;;  %v1577_v48 = vld [vmem:[#allocation7 + $0x40] sm:$0xff]   ;;  %v1578_v49 = vld [vmem:[#allocation7 + $0x48] sm:$0xff]  }
  0x40   :  { %1365 = vmatpush3.bf16.msra.mxu1 %v1570_v8  ;;  %v1579_v50 = vld [vmem:[#allocation7 + $0x50] sm:$0xff]   ;;  %v1580_v51 = vld [vmem:[#allocation7 + $0x58] sm:$0xff]   ;;  %v1581_v52 = vld [vmem:[#allocation7 + $0x60] sm:$0xff]  }
  0x41   :  { %1335 = vmatpush3.bf16.msra.mxu0 %v1555_v2  ;;  %1366 = vmatprep.subr.bf16.mxu1 %v1571_v10  ;;  %v1582_v53 = vld [vmem:[#allocation7 + $0x68] sm:$0xff]   ;;  %v1583_v54 = vld [vmem:[#allocation7 + $0x70] sm:$0xff]  }
  0x42   :  { %1336 = vmatprep.subr.bf16.mxu0 %v1556_v3 }
  0x44   :  { %1367 = vmatpush3.bf16.msra.mxu1 %v1571_v10 }
  0x45   :  { %1337 = vmatpush3.bf16.msra.mxu0 %v1556_v3  ;;  %1368 = vmatprep.subr.bf16.mxu1 %v1572_v12 }
  0x46   :  { %1338 = vmatprep.subr.bf16.mxu0 %v1557_v5 }
  0x48   :  { %1369 = vmatpush3.bf16.msra.mxu1 %v1572_v12 }
  0x49   :  { %1339 = vmatpush3.bf16.msra.mxu0 %v1557_v5  ;;  %1370 = vmatprep.subr.bf16.mxu1 %v1573_v13 }
  0x4a   :  { %1340 = vmatprep.subr.bf16.mxu0 %v1558_v6 }
  0x4c   :  { %1371 = vmatpush3.bf16.msra.mxu1 %v1573_v13 }
  0x4d   :  { %1341 = vmatpush3.bf16.msra.mxu0 %v1558_v6  ;;  %1372 = vmatprep.subr.bf16.mxu1 %v1574_v16 }
  0x4e   :  { %1342 = vmatprep.subr.bf16.mxu0 %v1559_v9 }
  0x50   :  { %1373 = vmatpush3.bf16.msra.mxu1 %v1574_v16 }
  0x51   :  { %1343 = vmatpush3.bf16.msra.mxu0 %v1559_v9  ;;  %1374 = vmatprep.subr.bf16.mxu1 %v1575_v17 }
  0x52   :  { %1344 = vmatprep.subr.bf16.mxu0 %v1560_v11 }
  0x54   :  { %1375 = vmatpush3.bf16.msra.mxu1 %v1575_v17 }
  0x55   :  { %1345 = vmatpush3.bf16.msra.mxu0 %v1560_v11  ;;  %1376 = vmatprep.subr.bf16.mxu1 %v1576_v23 }
  0x58   :  { %1347 = vmatmul.mubr.bf16.vlgmr.msra.gmra.mrb[0].mxu0 %v1807_v14  ;;  %1377 = vmatpush3.bf16.msra.mxu1 %v1576_v23 }
  0x59   :  { %1350 = vmatprep.mubr.bf16.mxu0 %v1809_v15  ;;  %1426 = vmatprep.subr.bf16.mxu1 %v1577_v48 }
  0x60   :  { %1351 = vmatmul.mubr.bf16.gmra.mrb[4].mxu0 %v1813_v18 }
  0x61   :  { %1354 = vmatprep.mubr.bf16.mxu0 %v1815_v19 }
  0x68   :  { %1355 = vmatmul.mubr.bf16.gmra.mrb[8].mxu0 %v1819_v20 }
  0x69   :  { %1358 = vmatprep.mubr.bf16.mxu0 %v1821_v21 }
  0x70   :  { %1359 = vmatmul.mubr.bf16.gmra.mrb[12].mxu0 %v1825_v22 }
  0x71   :  { %1410 = vmatprep.mubr.bf16.mxu0 %v1804_v4 }
 0x12b   :  { %v1348_v24 = vpop.f32.mrb[0].mxu0 }
 0x12c   :  { %v225_v25 = vpop.f32.mrb[1].mxu0 }
 0x12d   :  { %v1349_v26 = vpop.f32.mrb[2].mxu0 }
 0x12e   :  { %v289_v27 = vpack.c.bf16 %v1349_v26, %v1348_v24  ;;  %v228_v28 = vpop.f32.mrb[3].mxu0 }
 0x12f   :  { %v288_v29 = vpack.c.bf16 %v228_v28, %v225_v25 }
 0x131   :  { %1378 = vmatprep.mubr.bf16.mxu1 %v288_v29 }
 0x132   :  { %1379 = vmatmul.mubr.bf16.vlgmr.msra.gmra.mrb[0].mxu1 %v289_v27 }
 0x133   :  { %v1352_v30 = vpop.f32.mrb[4].mxu0  ;;  %1427 = vmatpush3.bf16.msra.mxu1 %v1577_v48 }
 0x134   :  { %v241_v31 = vpop.f32.mrb[5].mxu0  ;;  %1428 = vmatprep.subr.bf16.mxu1 %v1578_v49 }
 0x135   :  { %v1353_v32 = vpop.f32.mrb[6].mxu0 }
 0x136   :  { %v291_v33 = vpack.c.bf16 %v1353_v32, %v1352_v30  ;;  %v244_v34 = vpop.f32.mrb[7].mxu0 }
 0x137   :  { %v290_v35 = vpack.c.bf16 %v244_v34, %v241_v31  ;;  %1429 = vmatpush3.bf16.msra.mxu1 %v1578_v49 }
 0x138   :  { %1430 = vmatprep.subr.bf16.mxu1 %v1579_v50 }
 0x139   :  { %1382 = vmatprep.mubr.bf16.mxu1 %v290_v35 }
 0x13a   :  { %1383 = vmatmul.mubr.bf16.gmra.mrb[4].mxu1 %v291_v33 }
 0x13b   :  { %v1356_v36 = vpop.f32.mrb[8].mxu0  ;;  %1431 = vmatpush3.bf16.msra.mxu1 %v1579_v50 }
 0x13c   :  { %v257_v37 = vpop.f32.mrb[9].mxu0  ;;  %1432 = vmatprep.subr.bf16.mxu1 %v1580_v51 }
 0x13d   :  { %v1357_v38 = vpop.f32.mrb[10].mxu0 }
 0x13e   :  { %v293_v39 = vpack.c.bf16 %v1357_v38, %v1356_v36  ;;  %v260_v40 = vpop.f32.mrb[11].mxu0 }
 0x13f   :  { %v292_v41 = vpack.c.bf16 %v260_v40, %v257_v37  ;;  %1433 = vmatpush3.bf16.msra.mxu1 %v1580_v51 }
 0x140   :  { %1434 = vmatprep.subr.bf16.mxu1 %v1581_v52 }
 0x141   :  { %1386 = vmatprep.mubr.bf16.mxu1 %v292_v41 }
 0x142   :  { %1387 = vmatmul.mubr.bf16.gmra.mrb[8].mxu1 %v293_v39  ;;  %v1584_v39 = vld [vmem:[#allocation7 + $0x78] sm:$0xff]  }
 0x143   :  { %v1360_v42 = vpop.f32.mrb[12].mxu0  ;;  %1435 = vmatpush3.bf16.msra.mxu1 %v1581_v52 }
 0x144   :  { %v273_v43 = vpop.f32.mrb[13].mxu0  ;;  %1436 = vmatprep.subr.bf16.mxu1 %v1582_v53 }
 0x145   :  { %v1361_v44 = vpop.f32.mrb[14].mxu0 }
 0x146   :  { %v295_v45 = vpack.c.bf16 %v1361_v44, %v1360_v42  ;;  %v276_v46 = vpop.f32.mrb[15].mxu0 }
 0x147   :  { %v294_v47 = vpack.c.bf16 %v276_v46, %v273_v43  ;;  %1437 = vmatpush3.bf16.msra.mxu1 %v1582_v53 }
 0x148   :  { %1438 = vmatprep.subr.bf16.mxu1 %v1583_v54 }
 0x149   :  { %1390 = vmatprep.mubr.bf16.mxu1 %v294_v47 }
 0x14a   :  { %1391 = vmatmul.mubr.bf16.gmra.mrb[12].mxu1 %v295_v45 }
 0x14b   :  { %1439 = vmatpush3.bf16.msra.mxu1 %v1583_v54 }
 0x14c   :  { %1440 = vmatprep.subr.bf16.mxu1 %v1584_v39 }
 0x14f   :  { %1441 = vmatpush3.bf16.msra.mxu1 %v1584_v39  ;;  %v1585_v39 = vld [vmem:[#allocation7 + $0x80] sm:$0xff]  }
 0x150   :  { %1490 = vmatprep.subr.bf16.mxu1 %v1585_v39 }
 0x205   :  { %v1829_v55 = vpop.f32.mrb[0].mxu1 }
 0x206   :  { %v1831_v56 = vpop.f32.mrb[1].mxu1  ;;  %v459_v62 = vmax.f32 %v1829_v55, 0.0 }
 0x207   :  { %v1833_v57 = vpop.f32.mrb[2].mxu1  ;;  %v457_v59 = vmax.f32 %v1831_v56, 0.0 }
 0x208   :  { %v1835_v58 = vpop.f32.mrb[3].mxu1  ;;  %v460_v60 = vmax.f32 %v1833_v57, 0.0 }
 0x209   :  { %v458_v61 = vmax.f32 %v1835_v58, 0.0 }
 0x20a   :  { %v474_v0 = vpack.c.bf16 %v460_v60, %v459_v62 }
 0x20b   :  { %v473_v63 = vpack.c.bf16 %v458_v61, %v457_v59 }
 0x20d   :  { %v1849_v1 = vpop.f32.mrb[4].mxu1  ;;  %1394 = vmatprep.subr.bf16.mxu0 %v473_v63 }
 0x20e   :  { %v1851_v2 = vpop.f32.mrb[5].mxu1  ;;  %1395 = vmatpush3.bf16.msra.mxu0 %v473_v63  ;;  %v463_v9 = vmax.f32 %v1849_v1, 0.0 }
 0x20f   :  { %v1853_v3 = vpop.f32.mrb[6].mxu1  ;;  %1396 = vmatprep.subr.bf16.mxu0 %v474_v0  ;;  %v461_v6 = vmax.f32 %v1851_v2, 0.0 }
 0x210   :  { %v1855_v5 = vpop.f32.mrb[7].mxu1  ;;  %v464_v7 = vmax.f32 %v1853_v3, 0.0 }
 0x211   :  { %v462_v8 = vmax.f32 %v1855_v5, 0.0 }
 0x212   :  { %1397 = vmatpush3.bf16.msra.mxu0 %v474_v0  ;;  %v476_v11 = vpack.c.bf16 %v464_v7, %v463_v9 }
 0x213   :  { %v475_v10 = vpack.c.bf16 %v462_v8, %v461_v6 }
 0x215   :  { %v1869_v12 = vpop.f32.mrb[8].mxu1  ;;  %1398 = vmatprep.subr.bf16.mxu0 %v475_v10 }
 0x216   :  { %v1871_v13 = vpop.f32.mrb[9].mxu1  ;;  %1399 = vmatpush3.bf16.msra.mxu0 %v475_v10  ;;  %v467_v26 = vmax.f32 %v1869_v12, 0.0 }
 0x217   :  { %v1873_v16 = vpop.f32.mrb[10].mxu1  ;;  %1400 = vmatprep.subr.bf16.mxu0 %v476_v11  ;;  %v465_v23 = vmax.f32 %v1871_v13, 0.0 }
 0x218   :  { %v1875_v17 = vpop.f32.mrb[11].mxu1  ;;  %v468_v24 = vmax.f32 %v1873_v16, 0.0 }
 0x219   :  { %v466_v25 = vmax.f32 %v1875_v17, 0.0 }
 0x21a   :  { %1401 = vmatpush3.bf16.msra.mxu0 %v476_v11  ;;  %v478_v28 = vpack.c.bf16 %v468_v24, %v467_v26 }
 0x21b   :  { %v477_v27 = vpack.c.bf16 %v466_v25, %v465_v23 }
 0x21d   :  { %v1889_v29 = vpop.f32.mrb[12].mxu1  ;;  %1402 = vmatprep.subr.bf16.mxu0 %v477_v27 }
 0x21e   :  { %v1891_v30 = vpop.f32.mrb[13].mxu1  ;;  %1403 = vmatpush3.bf16.msra.mxu0 %v477_v27  ;;  %v471_v36 = vmax.f32 %v1889_v29, 0.0  ;;  %v1592_v29 = vld [vmem:[#allocation7 + $0xb8] sm:$0xff]  }
 0x21f   :  { %v1893_v31 = vpop.f32.mrb[14].mxu1  ;;  %1404 = vmatprep.subr.bf16.mxu0 %v478_v28  ;;  %v469_v33 = vmax.f32 %v1891_v30, 0.0 }
 0x220   :  { %v1895_v32 = vpop.f32.mrb[15].mxu1  ;;  %v472_v34 = vmax.f32 %v1893_v31, 0.0 }
 0x221   :  { %v470_v35 = vmax.f32 %v1895_v32, 0.0 }
 0x222   :  { %1405 = vmatpush3.bf16.msra.mxu0 %v478_v28  ;;  %v480_v38 = vpack.c.bf16 %v472_v34, %v471_v36 }
 0x223   :  { %v479_v37 = vpack.c.bf16 %v470_v35, %v469_v33 }
 0x225   :  { %1406 = vmatprep.subr.bf16.mxu0 %v479_v37 }
 0x226   :  { %1407 = vmatpush3.bf16.msra.mxu0 %v479_v37 }
 0x227   :  { %1408 = vmatprep.subr.bf16.mxu0 %v480_v38 }
 0x22a   :  { %1409 = vmatpush3.bf16.msra.mxu0 %v480_v38 }
 0x22d   :  { %1411 = vmatmul.mubr.bf16.vlgmr.msra.gmra.mrb[16].mxu0 %v1807_v14 }
 0x22e   :  { %1414 = vmatprep.mubr.bf16.mxu0 %v1809_v15 }
 0x235   :  { %1415 = vmatmul.mubr.bf16.gmra.mrb[20].mxu0 %v1813_v18 }
 0x236   :  { %1418 = vmatprep.mubr.bf16.mxu0 %v1815_v19 }
 0x23d   :  { %1419 = vmatmul.mubr.bf16.gmra.mrb[24].mxu0 %v1819_v20 }
 0x23e   :  { %1422 = vmatprep.mubr.bf16.mxu0 %v1821_v21 }
 0x245   :  { %1423 = vmatmul.mubr.bf16.gmra.mrb[28].mxu0 %v1825_v22 }
 0x246   :  { %1474 = vmatprep.mubr.bf16.mxu0 %v1804_v4 }
 0x300   :  { %v1412_v40 = vpop.f32.mrb[16].mxu0 }
 0x301   :  { %v515_v41 = vpop.f32.mrb[17].mxu0 }
 0x302   :  { %v1413_v42 = vpop.f32.mrb[18].mxu0 }
 0x303   :  { %v579_v43 = vpack.c.bf16 %v1413_v42, %v1412_v40  ;;  %v518_v44 = vpop.f32.mrb[19].mxu0  ;;  %v1586_v40 = vld [vmem:[#allocation7 + $0x88] sm:$0xff]   ;;  %v1588_v42 = vld [vmem:[#allocation7 + $0x98] sm:$0xff]  }
 0x304   :  { %v578_v45 = vpack.c.bf16 %v518_v44, %v515_v41  ;;  %v1587_v41 = vld [vmem:[#allocation7 + $0x90] sm:$0xff]   ;;  %v1590_v44 = vld [vmem:[#allocation7 + $0xa8] sm:$0xff]  }
 0x306   :  { %1442 = vmatprep.mubr.bf16.mxu1 %v578_v45  ;;  %v1591_v45 = vld [vmem:[#allocation7 + $0xb0] sm:$0xff]  }
 0x307   :  { %1443 = vmatmul.mubr.bf16.vlgmr.msra.gmra.mrb[16].mxu1 %v579_v43  ;;  %v1589_v43 = vld [vmem:[#allocation7 + $0xa0] sm:$0xff]  }
 0x308   :  { %v1416_v46 = vpop.f32.mrb[20].mxu0  ;;  %1491 = vmatpush3.bf16.msra.mxu1 %v1585_v39 }
 0x309   :  { %v531_v47 = vpop.f32.mrb[21].mxu0  ;;  %1492 = vmatprep.subr.bf16.mxu1 %v1586_v40 }
 0x30a   :  { %v1417_v48 = vpop.f32.mrb[22].mxu0 }
 0x30b   :  { %v581_v49 = vpack.c.bf16 %v1417_v48, %v1416_v46  ;;  %v534_v50 = vpop.f32.mrb[23].mxu0 }
 0x30c   :  { %v580_v51 = vpack.c.bf16 %v534_v50, %v531_v47  ;;  %1493 = vmatpush3.bf16.msra.mxu1 %v1586_v40 }
 0x30d   :  { %1494 = vmatprep.subr.bf16.mxu1 %v1587_v41 }
 0x30e   :  { %1446 = vmatprep.mubr.bf16.mxu1 %v580_v51 }
 0x30f   :  { %1447 = vmatmul.mubr.bf16.gmra.mrb[20].mxu1 %v581_v49 }
 0x310   :  { %v1420_v4 = vpop.f32.mrb[24].mxu0  ;;  %1495 = vmatpush3.bf16.msra.mxu1 %v1587_v41 }
 0x311   :  { %v547_v52 = vpop.f32.mrb[25].mxu0  ;;  %1496 = vmatprep.subr.bf16.mxu1 %v1588_v42 }
 0x312   :  { %v1421_v53 = vpop.f32.mrb[26].mxu0 }
 0x313   :  { %v583_v54 = vpack.c.bf16 %v1421_v53, %v1420_v4  ;;  %v550_v63 = vpop.f32.mrb[27].mxu0 }
 0x314   :  { %v582_v0 = vpack.c.bf16 %v550_v63, %v547_v52  ;;  %1497 = vmatpush3.bf16.msra.mxu1 %v1588_v42 }
 0x315   :  { %1498 = vmatprep.subr.bf16.mxu1 %v1589_v43 }
 0x316   :  { %1450 = vmatprep.mubr.bf16.mxu1 %v582_v0 }
 0x317   :  { %1451 = vmatmul.mubr.bf16.gmra.mrb[24].mxu1 %v583_v54 }
 0x318   :  { %v1424_v10 = vpop.f32.mrb[28].mxu0  ;;  %1499 = vmatpush3.bf16.msra.mxu1 %v1589_v43 }
 0x319   :  { %v563_v11 = vpop.f32.mrb[29].mxu0  ;;  %1500 = vmatprep.subr.bf16.mxu1 %v1590_v44 }
 0x31a   :  { %v1425_v27 = vpop.f32.mrb[30].mxu0 }
 0x31b   :  { %v585_v28 = vpack.c.bf16 %v1425_v27, %v1424_v10  ;;  %v566_v37 = vpop.f32.mrb[31].mxu0 }
 0x31c   :  { %v584_v38 = vpack.c.bf16 %v566_v37, %v563_v11  ;;  %1501 = vmatpush3.bf16.msra.mxu1 %v1590_v44 }
 0x31d   :  { %1502 = vmatprep.subr.bf16.mxu1 %v1591_v45 }
 0x31e   :  { %1454 = vmatprep.mubr.bf16.mxu1 %v584_v38 }
 0x31f   :  { %1455 = vmatmul.mubr.bf16.gmra.mrb[28].mxu1 %v585_v28 }
 0x320   :  { %1503 = vmatpush3.bf16.msra.mxu1 %v1591_v45 }
 0x321   :  { %1504 = vmatprep.subr.bf16.mxu1 %v1592_v29 }
 0x324   :  { %1505 = vmatpush3.bf16.msra.mxu1 %v1592_v29 }
 0x3da   :  { %v1444_v46 = vpop.f32.mrb[16].mxu1 }
 0x3db   :  { %v685_v47 = vpop.f32.mrb[17].mxu1  ;;  %v750_v4 = vmax.f32 %v1444_v46, 0.0 }
 0x3dc   :  { %v748_v48 = vmax.f32 %v685_v47, 0.0  ;;  %v1445_v49 = vpop.f32.mrb[18].mxu1 }
 0x3dd   :  { %v751_v50 = vmax.f32 %v1445_v49, 0.0  ;;  %v688_v51 = vpop.f32.mrb[19].mxu1  ;;  %v1931_v0 = vadd.f32 %v750_v4, %v459_v62 }
 0x3de   :  { %v749_v52 = vmax.f32 %v688_v51, 0.0  ;;  %v1919_v53 = vadd.f32 %v748_v48, %v457_v59 }
 0x3df   :  { %v1923_v54 = vadd.f32 %v751_v50, %v460_v60 }
 0x3e0   :  { %v1927_v63 = vadd.f32 %v749_v52, %v458_v61 }
 0x3e1   :  { %v781_v57 = vpack.c.bf16 %v1923_v54, %v1931_v0 }
 0x3e2   :  { %v1448_v10 = vpop.f32.mrb[20].mxu1  ;;  %v780_v11 = vpack.c.bf16 %v1927_v63, %v1919_v53 }
 0x3e3   :  { %v701_v27 = vpop.f32.mrb[21].mxu1  ;;  %v754_v58 = vmax.f32 %v1448_v10, 0.0 }
 0x3e4   :  { %v752_v56 = vmax.f32 %v701_v27, 0.0  ;;  %v1449_v59 = vpop.f32.mrb[22].mxu1  ;;  %1458 = vmatprep.subr.bf16.mxu0 %v780_v11 }
 0x3e5   :  { %v755_v60 = vmax.f32 %v1449_v59, 0.0  ;;  %v704_v28 = vpop.f32.mrb[23].mxu1  ;;  %1459 = vmatpush3.bf16.msra.mxu0 %v780_v11  ;;  %v1951_v38 = vadd.f32 %v754_v58, %v463_v9 }
 0x3e6   :  { %v753_v61 = vmax.f32 %v704_v28, 0.0  ;;  %1460 = vmatprep.subr.bf16.mxu0 %v781_v57  ;;  %v1939_v55 = vadd.f32 %v752_v56, %v461_v6 }
 0x3e7   :  { %v1943_v62 = vadd.f32 %v755_v60, %v464_v7 }
 0x3e8   :  { %v1947_v37 = vadd.f32 %v753_v61, %v462_v8  ;;  %v1716_v61 = vmov 0.0  }
 0x3e9   :  { %1461 = vmatpush3.bf16.msra.mxu0 %v781_v57  ;;  %v783_v3 = vpack.c.bf16 %v1943_v62, %v1951_v38 }
 0x3ea   :  { %v1452_v39 = vpop.f32.mrb[24].mxu1  ;;  %v782_v40 = vpack.c.bf16 %v1947_v37, %v1939_v55 }
 0x3eb   :  { %v717_v2 = vpop.f32.mrb[25].mxu1  ;;  %v758_v8 = vmax.f32 %v1452_v39, 0.0 }
 0x3ec   :  { %v756_v6 = vmax.f32 %v717_v2, 0.0  ;;  %v1453_v41 = vpop.f32.mrb[26].mxu1  ;;  %1462 = vmatprep.subr.bf16.mxu0 %v782_v40 }
 0x3ed   :  { %v759_v7 = vmax.f32 %v1453_v41, 0.0  ;;  %v720_v5 = vpop.f32.mrb[27].mxu1  ;;  %1463 = vmatpush3.bf16.msra.mxu0 %v782_v40  ;;  %v1971_v44 = vadd.f32 %v758_v8, %v467_v26 }
 0x3ee   :  { %v757_v42 = vmax.f32 %v720_v5, 0.0  ;;  %1464 = vmatprep.subr.bf16.mxu0 %v783_v3  ;;  %v1959_v1 = vadd.f32 %v756_v6, %v465_v23 }
 0x3ef   :  { %v1963_v9 = vadd.f32 %v759_v7, %v468_v24 }
 0x3f0   :  { %v1967_v43 = vadd.f32 %v757_v42, %v466_v25 }
 0x3f1   :  { %1465 = vmatpush3.bf16.msra.mxu0 %v783_v3  ;;  %v785_v16 = vpack.c.bf16 %v1963_v9, %v1971_v44 }
 0x3f2   :  { %v1456_v45 = vpop.f32.mrb[28].mxu1  ;;  %v784_v46 = vpack.c.bf16 %v1967_v43, %v1959_v1 }
 0x3f3   :  { %v733_v13 = vpop.f32.mrb[29].mxu1  ;;  %v762_v25 = vmax.f32 %v1456_v45, 0.0 }
 0x3f4   :  { %v760_v23 = vmax.f32 %v733_v13, 0.0  ;;  %v1457_v47 = vpop.f32.mrb[30].mxu1  ;;  %1466 = vmatprep.subr.bf16.mxu0 %v784_v46 }
 0x3f5   :  { %v763_v24 = vmax.f32 %v1457_v47, 0.0  ;;  %v736_v17 = vpop.f32.mrb[31].mxu1  ;;  %1467 = vmatpush3.bf16.msra.mxu0 %v784_v46  ;;  %v1991_v50 = vadd.f32 %v762_v25, %v471_v36 }
 0x3f6   :  { %v761_v48 = vmax.f32 %v736_v17, 0.0  ;;  %1468 = vmatprep.subr.bf16.mxu0 %v785_v16  ;;  %v1979_v12 = vadd.f32 %v760_v23, %v469_v33 }
 0x3f7   :  { %v1983_v26 = vadd.f32 %v763_v24, %v472_v34 }
 0x3f8   :  { %v1987_v49 = vadd.f32 %v761_v48, %v470_v35 }
 0x3f9   :  { %1469 = vmatpush3.bf16.msra.mxu0 %v785_v16  ;;  %v787_v30 = vpack.c.bf16 %v1983_v26, %v1991_v50 }
 0x3fa   :  { %v786_v51 = vpack.c.bf16 %v1987_v49, %v1979_v12 }
 0x3fc   :  { %1470 = vmatprep.subr.bf16.mxu0 %v786_v51 }
 0x3fd   :  { %1471 = vmatpush3.bf16.msra.mxu0 %v786_v51 }
 0x3fe   :  { %1472 = vmatprep.subr.bf16.mxu0 %v787_v30 }
 0x401   :  { %1473 = vmatpush3.bf16.msra.mxu0 %v787_v30 }
 0x402   :  { %1522 = vmatprep.subr.bf16.mxu0 %v1716_v61 }
 0x404   :  { %1475 = vmatmul.mubr.bf16.vlgmr.msra.gmra.mrb[32].mxu0 %v1807_v14 }
 0x405   :  { %1478 = vmatprep.mubr.bf16.mxu0 %v1809_v15 }
 0x40c   :  { %1479 = vmatmul.mubr.bf16.gmra.mrb[36].mxu0 %v1813_v18 }
 0x40d   :  { %1482 = vmatprep.mubr.bf16.mxu0 %v1815_v19 }
 0x414   :  { %1483 = vmatmul.mubr.bf16.gmra.mrb[40].mxu0 %v1819_v20 }
 0x415   :  { %1486 = vmatprep.mubr.bf16.mxu0 %v1821_v21 }
 0x41c   :  { %1487 = vmatmul.mubr.bf16.gmra.mrb[44].mxu0 %v1825_v22 }
 0x41d   :  { %1538 = vmatprep.mubr.msk.bf16.mxu0 %vm1717_vm0, %v1716_v61 }
 0x4d7   :  { %v1476_v31 = vpop.f32.mrb[32].mxu0 }
 0x4d8   :  { %v822_v32 = vpop.f32.mrb[33].mxu0 }
 0x4d9   :  { %v1477_v33 = vpop.f32.mrb[34].mxu0 }
 0x4da   :  { %v886_v34 = vpack.c.bf16 %v1477_v33, %v1476_v31  ;;  %v825_v14 = vpop.f32.mrb[35].mxu0 }
 0x4db   :  { %v885_v35 = vpack.c.bf16 %v825_v14, %v822_v32 }
 0x4dd   :  { %1506 = vmatprep.mubr.bf16.mxu1 %v885_v35 }
 0x4de   :  { %1507 = vmatmul.mubr.bf16.vlgmr.msra.gmra.mrb[32].mxu1 %v886_v34 }
 0x4df   :  { %v1480_v15 = vpop.f32.mrb[36].mxu0 }
 0x4e0   :  { %v838_v18 = vpop.f32.mrb[37].mxu0 }
 0x4e1   :  { %v1481_v19 = vpop.f32.mrb[38].mxu0 }
 0x4e2   :  { %v888_v36 = vpack.c.bf16 %v1481_v19, %v1480_v15  ;;  %v841_v20 = vpop.f32.mrb[39].mxu0 }
 0x4e3   :  { %v887_v4 = vpack.c.bf16 %v841_v20, %v838_v18 }
 0x4e5   :  { %1510 = vmatprep.mubr.bf16.mxu1 %v887_v4 }
 0x4e6   :  { %1511 = vmatmul.mubr.bf16.gmra.mrb[36].mxu1 %v888_v36 }
 0x4e7   :  { %v1484_v21 = vpop.f32.mrb[40].mxu0 }
 0x4e8   :  { %v854_v22 = vpop.f32.mrb[41].mxu0 }
 0x4e9   :  { %v1485_v52 = vpop.f32.mrb[42].mxu0 }
 0x4ea   :  { %v890_v10 = vpack.c.bf16 %v1485_v52, %v1484_v21  ;;  %v857_v11 = vpop.f32.mrb[43].mxu0 }
 0x4eb   :  { %v889_v27 = vpack.c.bf16 %v857_v11, %v854_v22 }
 0x4ed   :  { %1514 = vmatprep.mubr.bf16.mxu1 %v889_v27 }
 0x4ee   :  { %1515 = vmatmul.mubr.bf16.gmra.mrb[40].mxu1 %v890_v10 }
 0x4ef   :  { %v1488_v56 = vpop.f32.mrb[44].mxu0 }
 0x4f0   :  { %v870_v59 = vpop.f32.mrb[45].mxu0 }
 0x4f1   :  { %v1489_v57 = vpop.f32.mrb[46].mxu0 }
 0x4f2   :  { %v892_v60 = vpack.c.bf16 %v1489_v57, %v1488_v56  ;;  %v873_v28 = vpop.f32.mrb[47].mxu0 }
 0x4f3   :  { %v891_v58 = vpack.c.bf16 %v873_v28, %v870_v59 }
 0x4f5   :  { %1518 = vmatprep.mubr.bf16.mxu1 %v891_v58 }
 0x4f6   :  { %1519 = vmatmul.mubr.bf16.gmra.mrb[44].mxu1 %v892_v60 }
 0x5b1   :  { %v1508_v39 = vpop.f32.mrb[32].mxu1 }
 0x5b2   :  { %v1057_v40 = vmax.f32 %v1508_v39, 0.0  ;;  %v992_v2 = vpop.f32.mrb[33].mxu1 }
 0x5b3   :  { %v1055_v6 = vmax.f32 %v992_v2, 0.0  ;;  %v1509_v41 = vpop.f32.mrb[34].mxu1 }
 0x5b4   :  { %v1073_v3 = vadd.f32 %v1057_v40, %v1931_v0  ;;  %v1058_v7 = vmax.f32 %v1509_v41, 0.0  ;;  %v995_v5 = vpop.f32.mrb[35].mxu1 }
 0x5b5   :  { %v1071_v8 = vadd.f32 %v1055_v6, %v1919_v53  ;;  %v1056_v42 = vmax.f32 %v995_v5, 0.0 }
 0x5b6   :  { %1089 = vst [vmem:[#allocation8 + $0x10] sm:$0xff] %v1073_v3  ;;  %v1074_v45 = vadd.f32 %v1058_v7, %v1923_v54 }
 0x5b7   :  { %1087 = vst [vmem:[#allocation8] sm:$0xff] %v1071_v8  ;;  %v1072_v46 = vadd.f32 %v1056_v42, %v1927_v63 }
 0x5b8   :  { %1090 = vst [vmem:[#allocation8 + $0x18] sm:$0xff] %v1074_v45  ;;  %v1105_v13 = vpack.c.bf16 %v1074_v45, %v1073_v3 }
 0x5b9   :  { %1088 = vst [vmem:[#allocation8 + $0x8] sm:$0xff] %v1072_v46  ;;  %v1104_v23 = vpack.c.bf16 %v1072_v46, %v1071_v8  ;;  %v1512_v47 = vpop.f32.mrb[36].mxu1 }
 0x5ba   :  { %v1061_v16 = vmax.f32 %v1512_v47, 0.0  ;;  %v1008_v24 = vpop.f32.mrb[37].mxu1 }
 0x5bb   :  { %v1059_v17 = vmax.f32 %v1008_v24, 0.0  ;;  %v1513_v0 = vpop.f32.mrb[38].mxu1  ;;  %1523 = vmatpush3.bf16.msra.mxu0 %v1104_v23 }
 0x5bc   :  { %v1077_v25 = vadd.f32 %v1061_v16, %v1951_v38  ;;  %v1062_v53 = vmax.f32 %v1513_v0, 0.0  ;;  %v1011_v48 = vpop.f32.mrb[39].mxu1  ;;  %1524 = vmatprep.subr.bf16.mxu0 %v1716_v61 }
 0x5bd   :  { %v1075_v54 = vadd.f32 %v1059_v17, %v1939_v55  ;;  %v1060_v51 = vmax.f32 %v1011_v48, 0.0 }
 0x5be   :  { %1093 = vst [vmem:[#allocation8 + $0x30] sm:$0xff] %v1077_v25  ;;  %v1078_v63 = vadd.f32 %v1062_v53, %v1943_v62 }
 0x5bf   :  { %1091 = vst [vmem:[#allocation8 + $0x20] sm:$0xff] %v1075_v54  ;;  %v1076_v30 = vadd.f32 %v1060_v51, %v1947_v37  ;;  %1525 = vmatpush3.bf16.msra.mxu0 %v1105_v13 }
 0x5c0   :  { %1094 = vst [vmem:[#allocation8 + $0x38] sm:$0xff] %v1078_v63  ;;  %v1107_v29 = vpack.c.bf16 %v1078_v63, %v1077_v25  ;;  %1526 = vmatprep.subr.bf16.mxu0 %v1716_v61 }
 0x5c1   :  { %1092 = vst [vmem:[#allocation8 + $0x28] sm:$0xff] %v1076_v30  ;;  %v1106_v38 = vpack.c.bf16 %v1076_v30, %v1075_v54  ;;  %v1516_v31 = vpop.f32.mrb[40].mxu1 }
 0x5c2   :  { %v1065_v32 = vmax.f32 %v1516_v31, 0.0  ;;  %v1024_v33 = vpop.f32.mrb[41].mxu1 }
 0x5c3   :  { %v1063_v34 = vmax.f32 %v1024_v33, 0.0  ;;  %v1517_v14 = vpop.f32.mrb[42].mxu1  ;;  %1527 = vmatpush3.bf16.msra.mxu0 %v1106_v38 }
 0x5c4   :  { %v1081_v55 = vadd.f32 %v1065_v32, %v1971_v44  ;;  %v1066_v35 = vmax.f32 %v1517_v14, 0.0  ;;  %v1027_v62 = vpop.f32.mrb[43].mxu1  ;;  %1528 = vmatprep.subr.bf16.mxu0 %v1716_v61 }
 0x5c5   :  { %v1079_v37 = vadd.f32 %v1063_v34, %v1959_v1  ;;  %v1064_v15 = vmax.f32 %v1027_v62, 0.0 }
 0x5c6   :  { %1097 = vst [vmem:[#allocation8 + $0x50] sm:$0xff] %v1081_v55  ;;  %v1082_v18 = vadd.f32 %v1066_v35, %v1963_v9 }
 0x5c7   :  { %1095 = vst [vmem:[#allocation8 + $0x40] sm:$0xff] %v1079_v37  ;;  %v1080_v19 = vadd.f32 %v1064_v15, %v1967_v43  ;;  %1529 = vmatpush3.bf16.msra.mxu0 %v1107_v29 }
 0x5c8   :  { %1098 = vst [vmem:[#allocation8 + $0x58] sm:$0xff] %v1082_v18  ;;  %v1109_v36 = vpack.c.bf16 %v1082_v18, %v1081_v55  ;;  %1530 = vmatprep.subr.bf16.mxu0 %v1716_v61 }
 0x5c9   :  { %1096 = vst [vmem:[#allocation8 + $0x48] sm:$0xff] %v1080_v19  ;;  %v1108_v44 = vpack.c.bf16 %v1080_v19, %v1079_v37  ;;  %v1520_v20 = vpop.f32.mrb[44].mxu1 }
 0x5ca   :  { %v1069_v4 = vmax.f32 %v1520_v20, 0.0  ;;  %v1040_v21 = vpop.f32.mrb[45].mxu1 }
 0x5cb   :  { %v1067_v22 = vmax.f32 %v1040_v21, 0.0  ;;  %v1521_v52 = vpop.f32.mrb[46].mxu1  ;;  %1531 = vmatpush3.bf16.msra.mxu0 %v1108_v44 }
 0x5cc   :  { %v1085_v1 = vadd.f32 %v1069_v4, %v1991_v50  ;;  %v1070_v10 = vmax.f32 %v1521_v52, 0.0  ;;  %v1043_v9 = vpop.f32.mrb[47].mxu1  ;;  %1532 = vmatprep.subr.bf16.mxu0 %v1716_v61 }
 0x5cd   :  { %v1083_v43 = vadd.f32 %v1067_v22, %v1979_v12  ;;  %v1068_v11 = vmax.f32 %v1043_v9, 0.0  ;;  %v1103_v12 = vld [vmem:[%s2058_s2] sm:$0xf] }
 0x5ce   :  { %1101 = vst [vmem:[#allocation8 + $0x70] sm:$0xff] %v1085_v1  ;;  %v1086_v27 = vadd.f32 %v1070_v10, %v1983_v26 }
 0x5cf   :  { %1099 = vst [vmem:[#allocation8 + $0x60] sm:$0xff] %v1083_v43  ;;  %v1084_v56 = vadd.f32 %v1068_v11, %v1987_v49  ;;  %1533 = vmatpush3.bf16.msra.mxu0 %v1109_v36 }
 0x5d0   :  { %1102 = vst [vmem:[#allocation8 + $0x78] sm:$0xff] %v1086_v27  ;;  %v1111_v59 = vpack.c.bf16 %v1086_v27, %v1085_v1  ;;  %1534 = vmatprep.subr.bf16.mxu0 %v1716_v61 }
 0x5d1   :  { %1100 = vst [vmem:[#allocation8 + $0x68] sm:$0xff] %v1084_v56  ;;  %v1110_v50 = vpack.c.bf16 %v1084_v56, %v1083_v43 }
 0x5d3   :  { %1535 = vmatpush3.bf16.msra.mxu0 %v1110_v50 }
 0x5d4   :  { %1536 = vmatprep.subr.bf16.mxu0 %v1716_v61 }
 0x5d7   :  { %1537 = vmatpush3.bf16.msra.mxu0 %v1111_v59 }
 0x5da   :  { %1539 = vmatmul.mubr.bf16.vlgmr.msra.gmra.mrb[48].mxu0 %v1103_v12 }
 0x5db   :  { %1670 = shalt.err (!%p1667_p0)
}
 0x5dc   :  { %s1671_s10 = scalar_lea.hbm %s2060_s4, 2048 }
 0x5dd   :  { %p1672_p1 = scmp.ne.s32.totalorder %s2060_s4, %s1671_s10  ;;  %p1675_p2 = scmp.lt.u32.totalorder %s1671_s10, %s2060_s4 }
 0x5df   :  { %p1677_p3 = pnand %p1675_p2, %p1672_p1 }
 0x5e1   :  { %1680 = shalt.err (!%p1677_p3)
}
 0x5e2   :  { %s1719_s14 = smov 128   ;;  %s1720_s15 = smov 8  }
 0x5e3   :  { %1164 = dma.vmem_to_hbm [thread:$0]  %s1159_s6, 2048, %s2060_s4, [#allocation4], %s1719_s14, %s1719_s14, %s1720_s15  }
 0x5e4   :  { %s1721_s17 = smov [#allocation9]  }
 0x5e5   :  { %s1171_s18 = sshll.u32 %s1721_s17, 4  ;;  %s1172_s18 = int_to_ptr.vmem [resolvable:$true] %s1171_s18 }
 0x5e6   :  { %s1681_s19 = scalar_lea.vmem %s1172_s18, 128  ;;  %p1686_p5 = scmp.lt.s32.totalorder %s1172_s18, %s1172_s18 }
 0x5e7   :  { %p1682_p4 = scmp.ne.s32.totalorder %s1172_s18, %s1681_s19  ;;  %p1687_p6 = scmp.lt.s32.totalorder %s1681_s19, %s1681_s19 }
 0x5e9   :  { %p1688_p7 = por %p1687_p6, %p1686_p5 }
 0x5eb   :  { %p1689_p8 = pnand %p1688_p7, %p1682_p4 }
 0x6ad   :  { %v1146_v26 = vpop.f32.mrb[48].mxu0 }
 0x6ae   :  { %1152 = vst [vmem:[#allocation9] sm:$0xff] %v1146_v26  ;;  %v1540_v49 = vpop.f32.mrb[49].mxu0 }
 0x6af   :  { %v1149_v57 = vpop.f32.mrb[50].mxu0 }
 0x6b0   :  { %1692 = shalt.err (!%p1689_p8)
}
 0x6b1   :  { %s1693_s23 = scalar_lea.hbm %s2061_s5, 128 }
 0x6b2   :  { %p1694_p9 = scmp.ne.s32.totalorder %s2061_s5, %s1693_s23  ;;  %p1697_p10 = scmp.lt.u32.totalorder %s1693_s23, %s2061_s5 }
 0x6b4   :  { %p1699_p11 = pnand %p1697_p10, %p1694_p9 }
 0x6b6   :  { %1702 = shalt.err (!%p1699_p11)
}
 0x6b7   :  { %1174 = dma.vmem_to_hbm [thread:$0]  %s1172_s18, 128, %s2061_s5, [#allocation10]   ;;  %v1541_v60 = vpop.f32.mrb[51].mxu0 }
 0x6b8   :  { %1707 = dma.done.wait [#allocation4], 2048  }
 0x6b9   :  { %1708 = vsyncadd [#allocation4], 4294965248 }
 0x6ba   :  { %1709 = dma.done.wait [#allocation10], 128  }
 0x6bb   :  { %1710 = vsyncadd [#allocation10], 4294967168 }
 0x6bc   :  { %1181 = vsyncpa [#allocation3], 1 }
 0x6bd   :  { %1182 = vsyncpa [#allocation6], 1 }
 0x6be   :  { %1183 = vsyncpa [#allocation4], 1 }
 0x6bf   :  { %1184 = vsyncpa [#allocation10], 1 }

</bundles_post_ra>
